<compile_context>
chip_gen: v7x
topology: tpu7x:2x2x1
jax: 0.10.0
libtpu: 0.0.40
codegen_flags: <defaults>
</compile_context>

<pallas_src>
import functools

import numpy as np
import jax
import jax.numpy as jnp
from jax.experimental import pallas as pl
from jax.experimental.pallas import tpu as pltpu

LEAKY_SLOPE = 0.2
BN_EPS = 0.8            # nn.BatchNorm2d(out_filters, 0.8) -> second positional arg is eps
LANES = 128
WEIGHT_DTYPE = jnp.bfloat16


# ------------------------------- Pallas kernel ------------------------------ #

def _tap(ref, start, rows):
    """Strided sublane load: rows {start, start+2, ...} (the ky-shifted H slab)."""
    if rows == 1:
        return ref[pl.ds(start, 1), :]
    return ref[pl.ds(start, rows, stride=2), :]


def _critic_kernel(x0_ref, w0_ref, w1_ref, w2_ref, w3_ref, params_ref,
                   out_ref, s1_ref, s2_ref, s3_ref,
                   *, batch, layers, lin_w_row, lin_b_row):
    """Fused Critic forward.

    Activation layout: (rows, 128) with row = n*(H+1) + 1 + h (row n*(H+1) is a zero
    pad row realizing the top conv padding) and lane = w*Cin + ci (zero-padded to 128).
    """
    N = batch
    w_refs = (w0_ref, w1_ref, w2_ref, w3_ref)
    act_refs = (x0_ref, s1_ref, s2_ref, s3_ref)     # padded per-layer input buffers

    def prow(r):                                    # one (1, 128) row of the params slab
        return params_ref[pl.ds(r, 1), :]

    a = None
    for li, cfg in enumerate(layers):
        (h_in, ho, wo, cout, use_bn, fold_shifts, inv_count,
         bias_row, gamma_row, beta_row) = cfg
        src = act_refs[li]
        rps = h_in + 1                              # rows per sample (1 zero pad row + h_in)

        # Stage the previous block's output into the padded VMEM buffer (layer 0 is
        # already staged by the wrapper).
        if li > 0:
            for n in range(N):
                src[pl.ds(n * rps, 1), :] = jnp.zeros((1, LANES), jnp.float32)
                src[pl.ds(n * rps + 1, h_in), :] = a[n * h_in:(n + 1) * h_in, :]

        # im2row along H via strided sublane loads; the 3 ky taps are fused on the
        # lane (contraction) axis -> one MXU matmul per conv layer.
        rows = []
        for n in range(N):
            taps = [_tap(src, n * rps + ky, ho) for ky in range(3)]   # 3 x (ho, 128)
            rows.append(jnp.concatenate(taps, axis=1))                # (ho, 384)
        slab = jnp.concatenate(rows, axis=0) if N > 1 else rows[0]    # (N*ho, 384)

        # Conv 3x3 / stride 2 / pad 1 == slab @ W_stacked  (bf16 in, f32 accumulate).
        z = jnp.dot(slab.astype(WEIGHT_DTYPE), w_refs[li][...],
                    preferred_element_type=jnp.float32)               # (N*ho, wo*cout)
        z = z + prow(bias_row)

        # LeakyReLU(0.2) in f32 on the VPU.
        a = jnp.where(z >= 0.0, z, LEAKY_SLOPE * z)

        if use_bn:
            # Train-mode BatchNorm2d (batch stats, biased variance, eps=0.8).
            # Lane layout is w*cout + c, so the per-channel sum over the wo groups is
            # a log2(wo) butterfly of cyclic lane rolls; after folding, every lane
            # already holds its channel's statistic (broadcast for free).
            col = jnp.sum(a, axis=0, keepdims=True)                   # (1, 128)
            for s in fold_shifts:
                col = col + pltpu.roll(col, s, axis=1)
            mean_f = col * inv_count
            d = a - mean_f
            sq = jnp.sum(d * d, axis=0, keepdims=True)
            for s in fold_shifts:
                sq = sq + pltpu.roll(sq, s, axis=1)
            var_f = sq * inv_count
            scale_f = prow(gamma_row) * jax.lax.rsqrt(var_f + BN_EPS)
            a = d * scale_f + prow(beta_row)

    # Final Linear(128, 1): VPU multiply + lane reduction (no 1-lane MXU output).
    # Output is lane-dense (N, 128); column 0 carries the logit (lin_b is replicated
    # in every lane of its params row, so every lane equals logit_n + lin_b).
    w_row = prow(lin_w_row)                                           # (1, 128)
    b_row = prow(lin_b_row)                                           # (1, 128)
    out_ref[...] = jnp.sum(a * w_row, axis=-1, keepdims=True) + b_row


# --------------------------------- wrapper ---------------------------------- #

def critic_forward(img_nchw, blocks, lin_w, lin_b):
    """img_nchw: (N, C, H, W); blocks: [(w(3,3,Cin,Cout), b, gamma, beta)] * 4."""
    img = jnp.transpose(img_nchw, (0, 2, 3, 1)).astype(jnp.float32)   # NHWC
    N, H, W, C = img.shape
    use_bn_flags = (False, True, True, True)

    # Layer-0 input: one zero row on top of each sample (pad=1 in H) and zero lane
    # padding up to 128 -> (N*(H+1), 128).
    assert W * C <= LANES, "layer-0 row width must fit in 128 lanes"
    x0 = img.reshape(N, H, W * C)
    x0 = jnp.pad(x0, ((0, 0), (1, 0), (0, LANES - W * C)))
    x0 = x0.reshape(N * (H + 1), LANES)

    weights = []
    param_rows = []
    layer_cfg = []

    h, w, c = H, W, C
    for li, (wt, b, gamma, beta) in enumerate(blocks):
        cout = wt.shape[-1]
        ho = (h + 2 - 3) // 2 + 1
        wo = (w + 2 - 3) // 2 + 1
        assert wo * cout == LANES, "fused Critic kernel assumes 128-lane activations"

        # W-axis selection for stride 2 / pad 1: sel_w[kx, wi, wo] = 1 iff wi == 2*wo+kx-1.
        sel_w = np.zeros((3, w, wo), np.float32)
        for kx in range(3):
            for wo_i in range(wo):
                wi = 2 * wo_i + kx - 1
                if 0 <= wi < w:
                    sel_w[kx, wi, wo_i] = 1.0

        # B[ky, wi*Cin+ci, wo*Cout+co] = wt[ky, wi-(2wo-1), ci, co] (zero outside / pad),
        # then stack the 3 ky blocks along K and pad K to 128 per block -> (384, 128).
        b_mat = jnp.einsum("xio,yxcd->yicod", jnp.asarray(sel_w), wt)
        b_mat = b_mat.reshape(3, w * c, wo * cout)
        if w * c < LANES:
            b_mat = jnp.pad(b_mat, ((0, 0), (0, LANES - w * c), (0, 0)))
        weights.append(b_mat.reshape(3 * LANES, wo * cout).astype(WEIGHT_DTYPE))

        # Pre-tiled (1, 128) parameter rows (bias / gamma / beta), packed in one slab.
        bias_row = len(param_rows)
        param_rows.append(jnp.tile(b.reshape(1, cout), (1, wo)))
        gamma_row = beta_row = -1
        if use_bn_flags[li]:
            gamma_row = len(param_rows)
            param_rows.append(jnp.tile(gamma.reshape(1, cout), (1, wo)))
            beta_row = len(param_rows)
            param_rows.append(jnp.tile(beta.reshape(1, cout), (1, wo)))

        # Butterfly roll shifts for the per-channel (over wo groups) reduce+broadcast.
        shifts = []
        s = (wo * cout) // 2
        while s >= cout:
            shifts.append(s)
            s //= 2

        layer_cfg.append((h, ho, wo, cout, use_bn_flags[li], tuple(shifts),
                          1.0 / float(N * ho * wo), bias_row, gamma_row, beta_row))
        h, w, c = ho, wo, cout

    # TODO(synk): generalize for img_size // 16 > 1 (ds_size > 1); that needs the NCHW
    # flatten permutation folded into lin_w. This fused kernel assumes a 1x1 feature map.
    assert h == 1 and w == 1, "fused Critic kernel requires img_size // 2**4 == 1"

    lin_w_row = len(param_rows)
    param_rows.append(lin_w.reshape(1, LANES))
    lin_b_row = len(param_rows)
    param_rows.append(jnp.tile(lin_b.reshape(1, 1), (1, LANES)))

    pad_rows = (-len(param_rows)) % 8
    if pad_rows:
        param_rows = param_rows + [jnp.zeros((pad_rows, LANES), jnp.float32)]
    params = jnp.concatenate(param_rows, axis=0).astype(jnp.float32)

    inputs = [x0] + weights + [params]
    in_specs = [pl.BlockSpec(tuple(a.shape), lambda i: (0, 0)) for a in inputs]

    scratch_shapes = [
        pltpu.VMEM((N * (layer_cfg[1][0] + 1), LANES), jnp.float32),   # block-1 input
        pltpu.VMEM((N * (layer_cfg[2][0] + 1), LANES), jnp.float32),   # block-2 input
        pltpu.VMEM((N * (layer_cfg[3][0] + 1), LANES), jnp.float32),   # block-3 input
    ]

    out = pl.pallas_call(
        functools.partial(_critic_kernel, batch=N, layers=tuple(layer_cfg),
                          lin_w_row=lin_w_row, lin_b_row=lin_b_row),
        grid=(1,),
        in_specs=in_specs,
        out_specs=pl.BlockSpec((N, LANES), lambda i: (0, 0)),
        out_shape=jax.ShapeDtypeStruct((N, LANES), jnp.float32),
        scratch_shapes=scratch_shapes,
    )(*inputs)
    return out[:, :1]                                                  # (N, 1) validity


# ---------------------------- parameter set-up ------------------------------ #

def init_critic_params(key, channels=3, img_size=16):
    chans = [channels, 16, 32, 64, 128]
    blocks = []
    for i in range(4):
        cin, cout = chans[i], chans[i + 1]
        key, kw, kb = jax.random.split(key, 3)
        bound = 1.0 / jnp.sqrt(jnp.float32(cin * 9))
        w = jax.random.uniform(kw, (3, 3, cin, cout), jnp.float32, -bound, bound)
        b = jax.random.uniform(kb, (cout,), jnp.float32, -bound, bound)
        gamma = jnp.ones((cout,), jnp.float32)    # BatchNorm weight default
        beta = jnp.zeros((cout,), jnp.float32)    # BatchNorm bias default
        blocks.append((w, b, gamma, beta))

    ds_size = img_size // 2 ** 4
    in_feat = 128 * ds_size ** 2
    key, kw, kb = jax.random.split(key, 3)
    bound = 1.0 / jnp.sqrt(jnp.float32(in_feat))
    lin_w = jax.random.uniform(kw, (in_feat, 1), jnp.float32, -bound, bound)
    lin_b = jax.random.uniform(kb, (1, 1), jnp.float32, -bound, bound)
    return blocks, lin_w, lin_b


# ------------------------------------ main ----------------------------------- #

if __name__ == "__main__":
    channels, img_size, batch = 3, 16, 2   # ds_size = 16 // 16 = 1 -> Linear(128, 1)

    key = jax.random.PRNGKey(0)
    key, kx = jax.random.split(key)
    img = jax.random.normal(kx, (batch, channels, img_size, img_size), jnp.float32)

    blocks, lin_w, lin_b = init_critic_params(key, channels=channels, img_size=img_size)

    fwd = jax.jit(critic_forward)
    validity = fwd(img, blocks, lin_w, lin_b)
    jax.block_until_ready(validity)
    assert validity.shape == (batch, 1), validity.shape
    assert bool(jnp.all(jnp.isfinite(validity)))
    print("KERNEL_OK")
</pallas_src>

<mosaic_0001>
module attributes {stable_mosaic.version = 11 : i64} {
  func.func @_critic_kernel(%arg0: i32, %arg1: memref<34x128xf32, #tpu.memory_space<vmem>>, %arg2: memref<384x128xbf16, #tpu.memory_space<vmem>>, %arg3: memref<384x128xbf16, #tpu.memory_space<vmem>>, %arg4: memref<384x128xbf16, #tpu.memory_space<vmem>>, %arg5: memref<384x128xbf16, #tpu.memory_space<vmem>>, %arg6: memref<16x128xf32, #tpu.memory_space<vmem>>, %arg7: memref<2x128xf32, #tpu.memory_space<vmem>>, %arg8: memref<18x128xf32, #tpu.memory_space<vmem>>, %arg9: memref<10x128xf32, #tpu.memory_space<vmem>>, %arg10: memref<6x128xf32, #tpu.memory_space<vmem>>) attributes {dimension_semantics = [#tpu.dimension_semantics<arbitrary>], iteration_bounds = array<i64: 1>, scalar_prefetch = 0 : i64, scratch_operands = 3 : i64, tpu.core_type = #tpu.core_type<tc>, window_params = [{pipeline_mode = #tpu.pipeline_mode<synchronous>, transform_indices = @transform_0, window_bounds = array<i64: 34, 128>}, {pipeline_mode = #tpu.pipeline_mode<synchronous>, transform_indices = @transform_1, window_bounds = array<i64: 384, 128>}, {pipeline_mode = #tpu.pipeline_mode<synchronous>, transform_indices = @transform_2, window_bounds = array<i64: 384, 128>}, {pipeline_mode = #tpu.pipeline_mode<synchronous>, transform_indices = @transform_3, window_bounds = array<i64: 384, 128>}, {pipeline_mode = #tpu.pipeline_mode<synchronous>, transform_indices = @transform_4, window_bounds = array<i64: 384, 128>}, {pipeline_mode = #tpu.pipeline_mode<synchronous>, transform_indices = @transform_5, window_bounds = array<i64: 16, 128>}, {pipeline_mode = #tpu.pipeline_mode<synchronous>, transform_indices = @transform_6, window_bounds = array<i64: 2, 128>}]} {
    %c0 = arith.constant 0 : index
    %c0_0 = arith.constant 0 : index
    %0 = tpu.strided_load %arg1[%c0, %c0_0] {strides = array<i32: 2, 1>} : memref<34x128xf32, #tpu.memory_space<vmem>>, vector<8x128xf32>
    %c1 = arith.constant 1 : index
    %c0_1 = arith.constant 0 : index
    %1 = tpu.strided_load %arg1[%c1, %c0_1] {strides = array<i32: 2, 1>} : memref<34x128xf32, #tpu.memory_space<vmem>>, vector<8x128xf32>
    %c2 = arith.constant 2 : index
    %c0_2 = arith.constant 0 : index
    %2 = tpu.strided_load %arg1[%c2, %c0_2] {strides = array<i32: 2, 1>} : memref<34x128xf32, #tpu.memory_space<vmem>>, vector<8x128xf32>
    %3 = tpu.concatenate %0, %1, %2 in 1 : vector<8x128xf32>, vector<8x128xf32>, vector<8x128xf32> -> vector<8x384xf32>
    %c17 = arith.constant 17 : index
    %c0_3 = arith.constant 0 : index
    %4 = tpu.strided_load %arg1[%c17, %c0_3] {strides = array<i32: 2, 1>} : memref<34x128xf32, #tpu.memory_space<vmem>>, vector<8x128xf32>
    %c18 = arith.constant 18 : index
    %c0_4 = arith.constant 0 : index
    %5 = tpu.strided_load %arg1[%c18, %c0_4] {strides = array<i32: 2, 1>} : memref<34x128xf32, #tpu.memory_space<vmem>>, vector<8x128xf32>
    %c19 = arith.constant 19 : index
    %c0_5 = arith.constant 0 : index
    %6 = tpu.strided_load %arg1[%c19, %c0_5] {strides = array<i32: 2, 1>} : memref<34x128xf32, #tpu.memory_space<vmem>>, vector<8x128xf32>
    %7 = tpu.concatenate %4, %5, %6 in 1 : vector<8x128xf32>, vector<8x128xf32>, vector<8x128xf32> -> vector<8x384xf32>
    %8 = tpu.concatenate %3, %7 in 0 : vector<8x384xf32>, vector<8x384xf32> -> vector<16x384xf32>
    %9 = arith.truncf %8 : vector<16x384xf32> to vector<16x384xbf16>
    %c0_6 = arith.constant 0 : index
    %c0_7 = arith.constant 0 : index
    %10 = vector.load %arg2[%c0_6, %c0_7] : memref<384x128xbf16, #tpu.memory_space<vmem>>, vector<384x128xbf16>
    %cst = arith.constant dense<0.000000e+00> : vector<16x128xf32>
    %11 = tpu.matmul %9, %10, %cst {dimension_numbers = #tpu.dot_dimension_numbers<[1], [0], [0], [1], [0, 0, 1, 1], [], []>} : vector<16x384xbf16>, vector<384x128xbf16>, vector<16x128xf32> -> vector<16x128xf32>
    %c0_8 = arith.constant 0 : index
    %c0_9 = arith.constant 0 : index
    %12 = vector.load %arg6[%c0_8, %c0_9] : memref<16x128xf32, #tpu.memory_space<vmem>>, vector<1x128xf32>
    %13 = vector.broadcast %12 : vector<1x128xf32> to vector<16x128xf32>
    %14 = arith.addf %11, %13 : vector<16x128xf32>
    %cst_10 = arith.constant 0.000000e+00 : f32
    %15 = vector.broadcast %cst_10 : f32 to vector<16x128xf32>
    %16 = arith.cmpf oge, %14, %15 : vector<16x128xf32>
    %cst_11 = arith.constant 2.000000e-01 : f32
    %17 = vector.broadcast %cst_11 : f32 to vector<16x128xf32>
    %18 = arith.mulf %17, %14 : vector<16x128xf32>
    %19 = arith.select %16, %14, %18 : vector<16x128xi1>, vector<16x128xf32>
    %cst_12 = arith.constant 0.000000e+00 : f32
    %20 = vector.broadcast %cst_12 : f32 to vector<1x128xf32>
    %c0_13 = arith.constant 0 : index
    %c0_14 = arith.constant 0 : index
    %21 = vector.load %arg8[%c0_13, %c0_14] : memref<18x128xf32, #tpu.memory_space<vmem>>, vector<1x128xf32>
    tpu.vector_store %arg8[%c0_13, %c0_14], %20 {strides = array<i32>} : memref<18x128xf32, #tpu.memory_space<vmem>>, vector<1x128xf32>,
    %22 = vector.extract_strided_slice %19 {offsets = [0, 0], sizes = [8, 128], strides = [1, 1]} : vector<16x128xf32> to vector<8x128xf32>
    %c1_15 = arith.constant 1 : index
    %c0_16 = arith.constant 0 : index
    %23 = vector.load %arg8[%c1_15, %c0_16] : memref<18x128xf32, #tpu.memory_space<vmem>>, vector<8x128xf32>
    tpu.vector_store %arg8[%c1_15, %c0_16], %22 {strides = array<i32>} : memref<18x128xf32, #tpu.memory_space<vmem>>, vector<8x128xf32>,
    %cst_17 = arith.constant 0.000000e+00 : f32
    %24 = vector.broadcast %cst_17 : f32 to vector<1x128xf32>
    %c9 = arith.constant 9 : index
    %c0_18 = arith.constant 0 : index
    %25 = vector.load %arg8[%c9, %c0_18] : memref<18x128xf32, #tpu.memory_space<vmem>>, vector<1x128xf32>
    tpu.vector_store %arg8[%c9, %c0_18], %24 {strides = array<i32>} : memref<18x128xf32, #tpu.memory_space<vmem>>, vector<1x128xf32>,
    %26 = vector.extract_strided_slice %19 {offsets = [8, 0], sizes = [8, 128], strides = [1, 1]} : vector<16x128xf32> to vector<8x128xf32>
    %c10 = arith.constant 10 : index
    %c0_19 = arith.constant 0 : index
    %27 = vector.load %arg8[%c10, %c0_19] : memref<18x128xf32, #tpu.memory_space<vmem>>, vector<8x128xf32>
    tpu.vector_store %arg8[%c10, %c0_19], %26 {strides = array<i32>} : memref<18x128xf32, #tpu.memory_space<vmem>>, vector<8x128xf32>,
    %c0_20 = arith.constant 0 : index
    %c0_21 = arith.constant 0 : index
    %28 = tpu.strided_load %arg8[%c0_20, %c0_21] {strides = array<i32: 2, 1>} : memref<18x128xf32, #tpu.memory_space<vmem>>, vector<4x128xf32>
    %c1_22 = arith.constant 1 : index
    %c0_23 = arith.constant 0 : index
    %29 = tpu.strided_load %arg8[%c1_22, %c0_23] {strides = array<i32: 2, 1>} : memref<18x128xf32, #tpu.memory_space<vmem>>, vector<4x128xf32>
    %c2_24 = arith.constant 2 : index
    %c0_25 = arith.constant 0 : index
    %30 = tpu.strided_load %arg8[%c2_24, %c0_25] {strides = array<i32: 2, 1>} : memref<18x128xf32, #tpu.memory_space<vmem>>, vector<4x128xf32>
    %31 = tpu.concatenate %28, %29, %30 in 1 : vector<4x128xf32>, vector<4x128xf32>, vector<4x128xf32> -> vector<4x384xf32>
    %c9_26 = arith.constant 9 : index
    %c0_27 = arith.constant 0 : index
    %32 = tpu.strided_load %arg8[%c9_26, %c0_27] {strides = array<i32: 2, 1>} : memref<18x128xf32, #tpu.memory_space<vmem>>, vector<4x128xf32>
    %c10_28 = arith.constant 10 : index
    %c0_29 = arith.constant 0 : index
    %33 = tpu.strided_load %arg8[%c10_28, %c0_29] {strides = array<i32: 2, 1>} : memref<18x128xf32, #tpu.memory_space<vmem>>, vector<4x128xf32>
    %c11 = arith.constant 11 : index
    %c0_30 = arith.constant 0 : index
    %34 = tpu.strided_load %arg8[%c11, %c0_30] {strides = array<i32: 2, 1>} : memref<18x128xf32, #tpu.memory_space<vmem>>, vector<4x128xf32>
    %35 = tpu.concatenate %32, %33, %34 in 1 : vector<4x128xf32>, vector<4x128xf32>, vector<4x128xf32> -> vector<4x384xf32>
    %36 = tpu.concatenate %31, %35 in 0 : vector<4x384xf32>, vector<4x384xf32> -> vector<8x384xf32>
    %37 = arith.truncf %36 : vector<8x384xf32> to vector<8x384xbf16>
    %c0_31 = arith.constant 0 : index
    %c0_32 = arith.constant 0 : index
    %38 = vector.load %arg3[%c0_31, %c0_32] : memref<384x128xbf16, #tpu.memory_space<vmem>>, vector<384x128xbf16>
    %cst_33 = arith.constant dense<0.000000e+00> : vector<8x128xf32>
    %39 = tpu.matmul %37, %38, %cst_33 {dimension_numbers = #tpu.dot_dimension_numbers<[1], [0], [0], [1], [0, 0, 1, 1], [], []>} : vector<8x384xbf16>, vector<384x128xbf16>, vector<8x128xf32> -> vector<8x128xf32>
    %c1_34 = arith.constant 1 : index
    %c0_35 = arith.constant 0 : index
    %40 = vector.load %arg6[%c1_34, %c0_35] : memref<16x128xf32, #tpu.memory_space<vmem>>, vector<1x128xf32>
    %41 = vector.broadcast %40 : vector<1x128xf32> to vector<8x128xf32>
    %42 = arith.addf %39, %41 : vector<8x128xf32>
    %cst_36 = arith.constant 0.000000e+00 : f32
    %43 = vector.broadcast %cst_36 : f32 to vector<8x128xf32>
    %44 = arith.cmpf oge, %42, %43 : vector<8x128xf32>
    %cst_37 = arith.constant 2.000000e-01 : f32
    %45 = vector.broadcast %cst_37 : f32 to vector<8x128xf32>
    %46 = arith.mulf %45, %42 : vector<8x128xf32>
    %47 = arith.select %44, %42, %46 : vector<8x128xi1>, vector<8x128xf32>
    %cst_38 = arith.constant dense<0.000000e+00> : vector<128xf32>
    %48 = vector.multi_reduction <add>, %47, %cst_38 [0] : vector<8x128xf32> to vector<128xf32>
    %49 = vector.shape_cast %48 : vector<128xf32> to vector<1x128xf32>
    %c64_i32 = arith.constant 64 : i32
    %50 = tpu.dynamic_rotate %49 by %c64_i32 dim 1 : vector<1x128xf32>, i32 -> vector<1x128xf32>
    %51 = arith.addf %49, %50 : vector<1x128xf32>
    %c32_i32 = arith.constant 32 : i32
    %52 = tpu.dynamic_rotate %51 by %c32_i32 dim 1 : vector<1x128xf32>, i32 -> vector<1x128xf32>
    %53 = arith.addf %51, %52 : vector<1x128xf32>
    %cst_39 = arith.constant 3.125000e-02 : f32
    %54 = vector.broadcast %cst_39 : f32 to vector<1x128xf32>
    %55 = arith.mulf %53, %54 : vector<1x128xf32>
    %56 = vector.broadcast %55 : vector<1x128xf32> to vector<8x128xf32>
    %57 = arith.subf %47, %56 : vector<8x128xf32>
    %58 = arith.mulf %57, %57 : vector<8x128xf32>
    %cst_40 = arith.constant dense<0.000000e+00> : vector<128xf32>
    %59 = vector.multi_reduction <add>, %58, %cst_40 [0] : vector<8x128xf32> to vector<128xf32>
    %60 = vector.shape_cast %59 : vector<128xf32> to vector<1x128xf32>
    %c64_i32_41 = arith.constant 64 : i32
    %61 = tpu.dynamic_rotate %60 by %c64_i32_41 dim 1 : vector<1x128xf32>, i32 -> vector<1x128xf32>
    %62 = arith.addf %60, %61 : vector<1x128xf32>
    %c32_i32_42 = arith.constant 32 : i32
    %63 = tpu.dynamic_rotate %62 by %c32_i32_42 dim 1 : vector<1x128xf32>, i32 -> vector<1x128xf32>
    %64 = arith.addf %62, %63 : vector<1x128xf32>
    %cst_43 = arith.constant 3.125000e-02 : f32
    %65 = vector.broadcast %cst_43 : f32 to vector<1x128xf32>
    %66 = arith.mulf %64, %65 : vector<1x128xf32>
    %c2_44 = arith.constant 2 : index
    %c0_45 = arith.constant 0 : index
    %67 = vector.load %arg6[%c2_44, %c0_45] : memref<16x128xf32, #tpu.memory_space<vmem>>, vector<1x128xf32>
    %cst_46 = arith.constant 8.000000e-01 : f32
    %68 = vector.broadcast %cst_46 : f32 to vector<1x128xf32>
    %69 = arith.addf %66, %68 : vector<1x128xf32>
    %70 = math.rsqrt %69 : vector<1x128xf32>
    %71 = arith.mulf %67, %70 : vector<1x128xf32>
    %72 = vector.broadcast %71 : vector<1x128xf32> to vector<8x128xf32>
    %73 = arith.mulf %57, %72 : vector<8x128xf32>
    %c3 = arith.constant 3 : index
    %c0_47 = arith.constant 0 : index
    %74 = vector.load %arg6[%c3, %c0_47] : memref<16x128xf32, #tpu.memory_space<vmem>>, vector<1x128xf32>
    %75 = vector.broadcast %74 : vector<1x128xf32> to vector<8x128xf32>
    %76 = arith.addf %73, %75 : vector<8x128xf32>
    %cst_48 = arith.constant 0.000000e+00 : f32
    %77 = vector.broadcast %cst_48 : f32 to vector<1x128xf32>
    %c0_49 = arith.constant 0 : index
    %c0_50 = arith.constant 0 : index
    %78 = vector.load %arg9[%c0_49, %c0_50] : memref<10x128xf32, #tpu.memory_space<vmem>>, vector<1x128xf32>
    tpu.vector_store %arg9[%c0_49, %c0_50], %77 {strides = array<i32>} : memref<10x128xf32, #tpu.memory_space<vmem>>, vector<1x128xf32>,
    %79 = vector.extract_strided_slice %76 {offsets = [0, 0], sizes = [4, 128], strides = [1, 1]} : vector<8x128xf32> to vector<4x128xf32>
    %c1_51 = arith.constant 1 : index
    %c0_52 = arith.constant 0 : index
    %80 = vector.load %arg9[%c1_51, %c0_52] : memref<10x128xf32, #tpu.memory_space<vmem>>, vector<4x128xf32>
    tpu.vector_store %arg9[%c1_51, %c0_52], %79 {strides = array<i32>} : memref<10x128xf32, #tpu.memory_space<vmem>>, vector<4x128xf32>,
    %cst_53 = arith.constant 0.000000e+00 : f32
    %81 = vector.broadcast %cst_53 : f32 to vector<1x128xf32>
    %c5 = arith.constant 5 : index
    %c0_54 = arith.constant 0 : index
    %82 = vector.load %arg9[%c5, %c0_54] : memref<10x128xf32, #tpu.memory_space<vmem>>, vector<1x128xf32>
    tpu.vector_store %arg9[%c5, %c0_54], %81 {strides = array<i32>} : memref<10x128xf32, #tpu.memory_space<vmem>>, vector<1x128xf32>,
    %83 = vector.extract_strided_slice %76 {offsets = [4, 0], sizes = [4, 128], strides = [1, 1]} : vector<8x128xf32> to vector<4x128xf32>
    %c6 = arith.constant 6 : index
    %c0_55 = arith.constant 0 : index
    %84 = vector.load %arg9[%c6, %c0_55] : memref<10x128xf32, #tpu.memory_space<vmem>>, vector<4x128xf32>
    tpu.vector_store %arg9[%c6, %c0_55], %83 {strides = array<i32>} : memref<10x128xf32, #tpu.memory_space<vmem>>, vector<4x128xf32>,
    %c0_56 = arith.constant 0 : index
    %c0_57 = arith.constant 0 : index
    %85 = tpu.strided_load %arg9[%c0_56, %c0_57] {strides = array<i32: 2, 1>} : memref<10x128xf32, #tpu.memory_space<vmem>>, vector<2x128xf32>
    %c1_58 = arith.constant 1 : index
    %c0_59 = arith.constant 0 : index
    %86 = tpu.strided_load %arg9[%c1_58, %c0_59] {strides = array<i32: 2, 1>} : memref<10x128xf32, #tpu.memory_space<vmem>>, vector<2x128xf32>
    %c2_60 = arith.constant 2 : index
    %c0_61 = arith.constant 0 : index
    %87 = tpu.strided_load %arg9[%c2_60, %c0_61] {strides = array<i32: 2, 1>} : memref<10x128xf32, #tpu.memory_space<vmem>>, vector<2x128xf32>
    %88 = tpu.concatenate %85, %86, %87 in 1 : vector<2x128xf32>, vector<2x128xf32>, vector<2x128xf32> -> vector<2x384xf32>
    %c5_62 = arith.constant 5 : index
    %c0_63 = arith.constant 0 : index
    %89 = tpu.strided_load %arg9[%c5_62, %c0_63] {strides = array<i32: 2, 1>} : memref<10x128xf32, #tpu.memory_space<vmem>>, vector<2x128xf32>
    %c6_64 = arith.constant 6 : index
    %c0_65 = arith.constant 0 : index
    %90 = tpu.strided_load %arg9[%c6_64, %c0_65] {strides = array<i32: 2, 1>} : memref<10x128xf32, #tpu.memory_space<vmem>>, vector<2x128xf32>
    %c7 = arith.constant 7 : index
    %c0_66 = arith.constant 0 : index
    %91 = tpu.strided_load %arg9[%c7, %c0_66] {strides = array<i32: 2, 1>} : memref<10x128xf32, #tpu.memory_space<vmem>>, vector<2x128xf32>
    %92 = tpu.concatenate %89, %90, %91 in 1 : vector<2x128xf32>, vector<2x128xf32>, vector<2x128xf32> -> vector<2x384xf32>
    %93 = tpu.concatenate %88, %92 in 0 : vector<2x384xf32>, vector<2x384xf32> -> vector<4x384xf32>
    %94 = arith.truncf %93 : vector<4x384xf32> to vector<4x384xbf16>
    %c0_67 = arith.constant 0 : index
    %c0_68 = arith.constant 0 : index
    %95 = vector.load %arg4[%c0_67, %c0_68] : memref<384x128xbf16, #tpu.memory_space<vmem>>, vector<384x128xbf16>
    %cst_69 = arith.constant dense<0.000000e+00> : vector<4x128xf32>
    %96 = tpu.matmul %94, %95, %cst_69 {dimension_numbers = #tpu.dot_dimension_numbers<[1], [0], [0], [1], [0, 0, 1, 1], [], []>} : vector<4x384xbf16>, vector<384x128xbf16>, vector<4x128xf32> -> vector<4x128xf32>
    %c4 = arith.constant 4 : index
    %c0_70 = arith.constant 0 : index
    %97 = vector.load %arg6[%c4, %c0_70] : memref<16x128xf32, #tpu.memory_space<vmem>>, vector<1x128xf32>
    %98 = vector.broadcast %97 : vector<1x128xf32> to vector<4x128xf32>
    %99 = arith.addf %96, %98 : vector<4x128xf32>
    %cst_71 = arith.constant 0.000000e+00 : f32
    %100 = vector.broadcast %cst_71 : f32 to vector<4x128xf32>
    %101 = arith.cmpf oge, %99, %100 : vector<4x128xf32>
    %cst_72 = arith.constant 2.000000e-01 : f32
    %102 = vector.broadcast %cst_72 : f32 to vector<4x128xf32>
    %103 = arith.mulf %102, %99 : vector<4x128xf32>
    %104 = arith.select %101, %99, %103 : vector<4x128xi1>, vector<4x128xf32>
    %cst_73 = arith.constant dense<0.000000e+00> : vector<128xf32>
    %105 = vector.multi_reduction <add>, %104, %cst_73 [0] : vector<4x128xf32> to vector<128xf32>
    %106 = vector.shape_cast %105 : vector<128xf32> to vector<1x128xf32>
    %c64_i32_74 = arith.constant 64 : i32
    %107 = tpu.dynamic_rotate %106 by %c64_i32_74 dim 1 : vector<1x128xf32>, i32 -> vector<1x128xf32>
    %108 = arith.addf %106, %107 : vector<1x128xf32>
    %cst_75 = arith.constant 1.250000e-01 : f32
    %109 = vector.broadcast %cst_75 : f32 to vector<1x128xf32>
    %110 = arith.mulf %108, %109 : vector<1x128xf32>
    %111 = vector.broadcast %110 : vector<1x128xf32> to vector<4x128xf32>
    %112 = arith.subf %104, %111 : vector<4x128xf32>
    %113 = arith.mulf %112, %112 : vector<4x128xf32>
    %cst_76 = arith.constant dense<0.000000e+00> : vector<128xf32>
    %114 = vector.multi_reduction <add>, %113, %cst_76 [0] : vector<4x128xf32> to vector<128xf32>
    %115 = vector.shape_cast %114 : vector<128xf32> to vector<1x128xf32>
    %c64_i32_77 = arith.constant 64 : i32
    %116 = tpu.dynamic_rotate %115 by %c64_i32_77 dim 1 : vector<1x128xf32>, i32 -> vector<1x128xf32>
    %117 = arith.addf %115, %116 : vector<1x128xf32>
    %cst_78 = arith.constant 1.250000e-01 : f32
    %118 = vector.broadcast %cst_78 : f32 to vector<1x128xf32>
    %119 = arith.mulf %117, %118 : vector<1x128xf32>
    %c5_79 = arith.constant 5 : index
    %c0_80 = arith.constant 0 : index
    %120 = vector.load %arg6[%c5_79, %c0_80] : memref<16x128xf32, #tpu.memory_space<vmem>>, vector<1x128xf32>
    %cst_81 = arith.constant 8.000000e-01 : f32
    %121 = vector.broadcast %cst_81 : f32 to vector<1x128xf32>
    %122 = arith.addf %119, %121 : vector<1x128xf32>
    %123 = math.rsqrt %122 : vector<1x128xf32>
    %124 = arith.mulf %120, %123 : vector<1x128xf32>
    %125 = vector.broadcast %124 : vector<1x128xf32> to vector<4x128xf32>
    %126 = arith.mulf %112, %125 : vector<4x128xf32>
    %c6_82 = arith.constant 6 : index
    %c0_83 = arith.constant 0 : index
    %127 = vector.load %arg6[%c6_82, %c0_83] : memref<16x128xf32, #tpu.memory_space<vmem>>, vector<1x128xf32>
    %128 = vector.broadcast %127 : vector<1x128xf32> to vector<4x128xf32>
    %129 = arith.addf %126, %128 : vector<4x128xf32>
    %cst_84 = arith.constant 0.000000e+00 : f32
    %130 = vector.broadcast %cst_84 : f32 to vector<1x128xf32>
    %c0_85 = arith.constant 0 : index
    %c0_86 = arith.constant 0 : index
    %131 = vector.load %arg10[%c0_85, %c0_86] : memref<6x128xf32, #tpu.memory_space<vmem>>, vector<1x128xf32>
    tpu.vector_store %arg10[%c0_85, %c0_86], %130 {strides = array<i32>} : memref<6x128xf32, #tpu.memory_space<vmem>>, vector<1x128xf32>,
    %132 = vector.extract_strided_slice %129 {offsets = [0, 0], sizes = [2, 128], strides = [1, 1]} : vector<4x128xf32> to vector<2x128xf32>
    %c1_87 = arith.constant 1 : index
    %c0_88 = arith.constant 0 : index
    %133 = vector.load %arg10[%c1_87, %c0_88] : memref<6x128xf32, #tpu.memory_space<vmem>>, vector<2x128xf32>
    tpu.vector_store %arg10[%c1_87, %c0_88], %132 {strides = array<i32>} : memref<6x128xf32, #tpu.memory_space<vmem>>, vector<2x128xf32>,
    %cst_89 = arith.constant 0.000000e+00 : f32
    %134 = vector.broadcast %cst_89 : f32 to vector<1x128xf32>
    %c3_90 = arith.constant 3 : index
    %c0_91 = arith.constant 0 : index
    %135 = vector.load %arg10[%c3_90, %c0_91] : memref<6x128xf32, #tpu.memory_space<vmem>>, vector<1x128xf32>
    tpu.vector_store %arg10[%c3_90, %c0_91], %134 {strides = array<i32>} : memref<6x128xf32, #tpu.memory_space<vmem>>, vector<1x128xf32>,
    %136 = vector.extract_strided_slice %129 {offsets = [2, 0], sizes = [2, 128], strides = [1, 1]} : vector<4x128xf32> to vector<2x128xf32>
    %c4_92 = arith.constant 4 : index
    %c0_93 = arith.constant 0 : index
    %137 = vector.load %arg10[%c4_92, %c0_93] : memref<6x128xf32, #tpu.memory_space<vmem>>, vector<2x128xf32>
    tpu.vector_store %arg10[%c4_92, %c0_93], %136 {strides = array<i32>} : memref<6x128xf32, #tpu.memory_space<vmem>>, vector<2x128xf32>,
    %c0_94 = arith.constant 0 : index
    %c0_95 = arith.constant 0 : index
    %138 = vector.load %arg10[%c0_94, %c0_95] : memref<6x128xf32, #tpu.memory_space<vmem>>, vector<1x128xf32>
    %c1_96 = arith.constant 1 : index
    %c0_97 = arith.constant 0 : index
    %139 = vector.load %arg10[%c1_96, %c0_97] : memref<6x128xf32, #tpu.memory_space<vmem>>, vector<1x128xf32>
    %c2_98 = arith.constant 2 : index
    %c0_99 = arith.constant 0 : index
    %140 = vector.load %arg10[%c2_98, %c0_99] : memref<6x128xf32, #tpu.memory_space<vmem>>, vector<1x128xf32>
    %141 = tpu.concatenate %138, %139, %140 in 1 : vector<1x128xf32>, vector<1x128xf32>, vector<1x128xf32> -> vector<1x384xf32>
    %c3_100 = arith.constant 3 : index
    %c0_101 = arith.constant 0 : index
    %142 = vector.load %arg10[%c3_100, %c0_101] : memref<6x128xf32, #tpu.memory_space<vmem>>, vector<1x128xf32>
    %c4_102 = arith.constant 4 : index
    %c0_103 = arith.constant 0 : index
    %143 = vector.load %arg10[%c4_102, %c0_103] : memref<6x128xf32, #tpu.memory_space<vmem>>, vector<1x128xf32>
    %c5_104 = arith.constant 5 : index
    %c0_105 = arith.constant 0 : index
    %144 = vector.load %arg10[%c5_104, %c0_105] : memref<6x128xf32, #tpu.memory_space<vmem>>, vector<1x128xf32>
    %145 = tpu.concatenate %142, %143, %144 in 1 : vector<1x128xf32>, vector<1x128xf32>, vector<1x128xf32> -> vector<1x384xf32>
    %146 = tpu.concatenate %141, %145 in 0 : vector<1x384xf32>, vector<1x384xf32> -> vector<2x384xf32>
    %147 = arith.truncf %146 : vector<2x384xf32> to vector<2x384xbf16>
    %c0_106 = arith.constant 0 : index
    %c0_107 = arith.constant 0 : index
    %148 = vector.load %arg5[%c0_106, %c0_107] : memref<384x128xbf16, #tpu.memory_space<vmem>>, vector<384x128xbf16>
    %cst_108 = arith.constant dense<0.000000e+00> : vector<2x128xf32>
    %149 = tpu.matmul %147, %148, %cst_108 {dimension_numbers = #tpu.dot_dimension_numbers<[1], [0], [0], [1], [0, 0, 1, 1], [], []>} : vector<2x384xbf16>, vector<384x128xbf16>, vector<2x128xf32> -> vector<2x128xf32>
    %c7_109 = arith.constant 7 : index
    %c0_110 = arith.constant 0 : index
    %150 = vector.load %arg6[%c7_109, %c0_110] : memref<16x128xf32, #tpu.memory_space<vmem>>, vector<1x128xf32>
    %151 = vector.broadcast %150 : vector<1x128xf32> to vector<2x128xf32>
    %152 = arith.addf %149, %151 : vector<2x128xf32>
    %cst_111 = arith.constant 0.000000e+00 : f32
    %153 = vector.broadcast %cst_111 : f32 to vector<2x128xf32>
    %154 = arith.cmpf oge, %152, %153 : vector<2x128xf32>
    %cst_112 = arith.constant 2.000000e-01 : f32
    %155 = vector.broadcast %cst_112 : f32 to vector<2x128xf32>
    %156 = arith.mulf %155, %152 : vector<2x128xf32>
    %157 = arith.select %154, %152, %156 : vector<2x128xi1>, vector<2x128xf32>
    %cst_113 = arith.constant dense<0.000000e+00> : vector<128xf32>
    %158 = vector.multi_reduction <add>, %157, %cst_113 [0] : vector<2x128xf32> to vector<128xf32>
    %159 = vector.shape_cast %158 : vector<128xf32> to vector<1x128xf32>
    %cst_114 = arith.constant 5.000000e-01 : f32
    %160 = vector.broadcast %cst_114 : f32 to vector<1x128xf32>
    %161 = arith.mulf %159, %160 : vector<1x128xf32>
    %162 = vector.broadcast %161 : vector<1x128xf32> to vector<2x128xf32>
    %163 = arith.subf %157, %162 : vector<2x128xf32>
    %164 = arith.mulf %163, %163 : vector<2x128xf32>
    %cst_115 = arith.constant dense<0.000000e+00> : vector<128xf32>
    %165 = vector.multi_reduction <add>, %164, %cst_115 [0] : vector<2x128xf32> to vector<128xf32>
    %166 = vector.shape_cast %165 : vector<128xf32> to vector<1x128xf32>
    %cst_116 = arith.constant 5.000000e-01 : f32
    %167 = vector.broadcast %cst_116 : f32 to vector<1x128xf32>
    %168 = arith.mulf %166, %167 : vector<1x128xf32>
    %c8 = arith.constant 8 : index
    %c0_117 = arith.constant 0 : index
    %169 = vector.load %arg6[%c8, %c0_117] : memref<16x128xf32, #tpu.memory_space<vmem>>, vector<1x128xf32>
    %cst_118 = arith.constant 8.000000e-01 : f32
    %170 = vector.broadcast %cst_118 : f32 to vector<1x128xf32>
    %171 = arith.addf %168, %170 : vector<1x128xf32>
    %172 = math.rsqrt %171 : vector<1x128xf32>
    %173 = arith.mulf %169, %172 : vector<1x128xf32>
    %174 = vector.broadcast %173 : vector<1x128xf32> to vector<2x128xf32>
    %175 = arith.mulf %163, %174 : vector<2x128xf32>
    %c9_119 = arith.constant 9 : index
    %c0_120 = arith.constant 0 : index
    %176 = vector.load %arg6[%c9_119, %c0_120] : memref<16x128xf32, #tpu.memory_space<vmem>>, vector<1x128xf32>
    %177 = vector.broadcast %176 : vector<1x128xf32> to vector<2x128xf32>
    %178 = arith.addf %175, %177 : vector<2x128xf32>
    %c10_121 = arith.constant 10 : index
    %c0_122 = arith.constant 0 : index
    %179 = vector.load %arg6[%c10_121, %c0_122] : memref<16x128xf32, #tpu.memory_space<vmem>>, vector<1x128xf32>
    %c11_123 = arith.constant 11 : index
    %c0_124 = arith.constant 0 : index
    %180 = vector.load %arg6[%c11_123, %c0_124] : memref<16x128xf32, #tpu.memory_space<vmem>>, vector<1x128xf32>
    %181 = vector.broadcast %179 : vector<1x128xf32> to vector<2x128xf32>
    %182 = arith.mulf %178, %181 : vector<2x128xf32>
    %cst_125 = arith.constant dense<0.000000e+00> : vector<2xf32>
    %183 = vector.multi_reduction <add>, %182, %cst_125 [1] : vector<2x128xf32> to vector<2xf32>
    %184 = vector.shape_cast %183 : vector<2xf32> to vector<2x1xf32>
    %185 = vector.broadcast %184 : vector<2x1xf32> to vector<2x128xf32>
    %186 = vector.broadcast %180 : vector<1x128xf32> to vector<2x128xf32>
    %187 = arith.addf %185, %186 : vector<2x128xf32>
    %c0_126 = arith.constant 0 : index
    %c0_127 = arith.constant 0 : index
    %188 = vector.load %arg7[%c0_126, %c0_127] : memref<2x128xf32, #tpu.memory_space<vmem>>, vector<2x128xf32>
    tpu.vector_store %arg7[%c0_126, %c0_127], %187 {strides = array<i32>} : memref<2x128xf32, #tpu.memory_space<vmem>>, vector<2x128xf32>,
    return
  }
  func.func @transform_0(%arg0: i32) -> (i32, i32) {
    %c0_i32 = arith.constant 0 : i32
    %c0_i32_0 = arith.constant 0 : i32
    %c0_i32_1 = arith.constant 0 : i32
    return %c0_i32, %c0_i32_0 : i32, i32
  }
  func.func @transform_1(%arg0: i32) -> (i32, i32) {
    %c0_i32 = arith.constant 0 : i32
    %c0_i32_0 = arith.constant 0 : i32
    %c0_i32_1 = arith.constant 0 : i32
    return %c0_i32, %c0_i32_0 : i32, i32
  }
  func.func @transform_2(%arg0: i32) -> (i32, i32) {
    %c0_i32 = arith.constant 0 : i32
    %c0_i32_0 = arith.constant 0 : i32
    %c0_i32_1 = arith.constant 0 : i32
    return %c0_i32, %c0_i32_0 : i32, i32
  }
  func.func @transform_3(%arg0: i32) -> (i32, i32) {
    %c0_i32 = arith.constant 0 : i32
    %c0_i32_0 = arith.constant 0 : i32
    %c0_i32_1 = arith.constant 0 : i32
    return %c0_i32, %c0_i32_0 : i32, i32
  }
  func.func @transform_4(%arg0: i32) -> (i32, i32) {
    %c0_i32 = arith.constant 0 : i32
    %c0_i32_0 = arith.constant 0 : i32
    %c0_i32_1 = arith.constant 0 : i32
    return %c0_i32, %c0_i32_0 : i32, i32
  }
  func.func @transform_5(%arg0: i32) -> (i32, i32) {
    %c0_i32 = arith.constant 0 : i32
    %c0_i32_0 = arith.constant 0 : i32
    %c0_i32_1 = arith.constant 0 : i32
    return %c0_i32, %c0_i32_0 : i32, i32
  }
  func.func @transform_6(%arg0: i32) -> (i32, i32) {
    %c0_i32 = arith.constant 0 : i32
    %c0_i32_0 = arith.constant 0 : i32
    %c0_i32_1 = arith.constant 0 : i32
    return %c0_i32, %c0_i32_0 : i32, i32
  }
}

</mosaic_0001>

<bundles_post_ra>
// kernel: critic_forward.1
= control target key start
LH: loop header
LB: loop body
LE: loop exit
PB: predicated region body
PF: predicated region fallthrough
CT: control target
= control target key end

     0   :  { %v1814_v1 = vmov 0.0   ;;  %vm1815_vm0 = vmmov 0   ;;  %vm347_vm3 = vcmask 1043456   ;;  %s1816_s8 = smov 64   ;;  %s1817_s9 = smov 32   ;;  %vm705_vm5 = vcmask 1041408   ;;  %s2278_s1 = inlined_call_operand.vmem [shape: bf16[384,128], index: 1, kind: input, shape index: {}]   ;;  %s2279_s0 = inlined_call_operand.vmem [shape: f32[34,128], index: 0, kind: input, shape index: {}]   ;;  %s2280_s2 = inlined_call_operand.vmem [shape: bf16[384,128], index: 2, kind: input, shape index: {}]   ;;  %s2281_s5 = inlined_call_operand.vmem [shape: f32[16,128], index: 5, kind: input, shape index: {}]   ;;  %s2282_s3 = inlined_call_operand.vmem [shape: bf16[384,128], index: 3, kind: input, shape index: {}]   ;;  %s2283_s4 = inlined_call_operand.vmem [shape: bf16[384,128], index: 4, kind: input, shape index: {}]   ;;  %s2284_s6 = inlined_call_operand.vmem [shape: f32[2,128], index: 6, kind: output, shape index: {}]  }
   0x1   :  { %v1712_v0 = vld [vmem:[%s2278_s1 + $0x40] sm:$0xff]   ;;  %1628 = vmatprep.subr.bf16.mxu1 %v1814_v1  ;;  %323 = vst [vmem:[#allocation2] sm:$0x1] %v1814_v1  ;;  %325 = vst [vmem:[#allocation2 + $0x9] sm:$0x1] %v1814_v1  ;;  %1644 = vmatprep.mubr.msk.bf16.mxu1 %vm1815_vm0, %v1814_v1  ;;  %v1715_v4 = vld [vmem:[%s2278_s1 + $0x48] sm:$0xff]  }
   0x2   :  { %681 = vst [vmem:[#allocation3] sm:$0x1] %v1814_v1  ;;  %683 = vst [vmem:[#allocation3 + $0x5] sm:$0x1] %v1814_v1  ;;  %v1713_v2 = vld [vmem:[%s2278_s1] sm:$0xff]   ;;  %1504 = vmatprep.subr.bf16.mxu0 %v1712_v0  ;;  %v1716_v5 = vld [vmem:[%s2278_s1 + $0x8] sm:$0xff]  }
   0x3   :  { %1035 = vst [vmem:[#allocation4] sm:$0x1] %v1814_v1  ;;  %1037 = vst [vmem:[#allocation4 + $0x3] sm:$0x1] %v1814_v1  ;;  %v1714_v3 = vld [vmem:[%s2278_s1 + $0x80] sm:$0xff]   ;;  %1505 = vmatpush3.bf16.msra.mxu0 %v1713_v2  ;;  %v1717_v6 = vld [vmem:[%s2278_s1 + $0x88] sm:$0xff]  }
   0x4   :  { %1629 = vmatpush3.bf16.msra.mxu1 %v1714_v3  ;;  %1506 = vmatprep.subr.bf16.mxu0 %v1715_v4  ;;  %v1718_v7 = vld [vmem:[%s2278_s1 + $0x50] sm:$0xff]   ;;  %v1721_v10 = vld [vmem:[%s2278_s1 + $0x58] sm:$0xff]   ;;  %v1724_v13 = vld [vmem:[%s2278_s1 + $0x60] sm:$0xff]   ;;  %vm1054_vm7 = vcmask 1040384  }
   0x5   :  { %1630 = vmatprep.subr.bf16.mxu1 %v1814_v1  ;;  %v1719_v8 = vld [vmem:[%s2278_s1 + $0x10] sm:$0xff]   ;;  %v1722_v11 = vld [vmem:[%s2278_s1 + $0x18] sm:$0xff]   ;;  %v1725_v14 = vld [vmem:[%s2278_s1 + $0x20] sm:$0xff]  }
   0x6   :  { %v1720_v9 = vld [vmem:[%s2278_s1 + $0x90] sm:$0xff]   ;;  %v1723_v12 = vld [vmem:[%s2278_s1 + $0x98] sm:$0xff]   ;;  %v1726_v15 = vld [vmem:[%s2278_s1 + $0xa0] sm:$0xff]  }
   0x7   :  { %1507 = vmatpush3.bf16.msra.mxu0 %v1716_v5  ;;  %v1727_v16 = vld [vmem:[%s2278_s1 + $0x68] sm:$0xff]   ;;  %v1730_v19 = vld [vmem:[%s2278_s1 + $0x70] sm:$0xff]   ;;  %v1733_v24 = vld [vmem:[%s2278_s1 + $0x78] sm:$0xff]  }
   0x8   :  { %1631 = vmatpush3.bf16.msra.mxu1 %v1717_v6  ;;  %1508 = vmatprep.subr.bf16.mxu0 %v1718_v7  ;;  %v1728_v17 = vld [vmem:[%s2278_s1 + $0x28] sm:$0xff]   ;;  %v1731_v20 = vld [vmem:[%s2278_s1 + $0x30] sm:$0xff]   ;;  %v1734_v26 = vld [vmem:[%s2278_s1 + $0x38] sm:$0xff]  }
   0x9   :  { %1632 = vmatprep.subr.bf16.mxu1 %v1814_v1  ;;  %v1729_v18 = vld [vmem:[%s2278_s1 + $0xa8] sm:$0xff]   ;;  %v1397_v22 = vld [vmem:[%s2279_s0 + $0x12] ss:$2 sm:$0xff]  ;;  %v1396_v28 = vld [vmem:[%s2279_s0 + $0x11] ss:$2 sm:$0xff] }
   0xa   :  { %v1394_v21 = vld [vmem:[%s2279_s0 + $0x1] ss:$2 sm:$0xff]  ;;  %v1732_v23 = vld [vmem:[%s2278_s1 + $0xb0] sm:$0xff]   ;;  %v24_v27 = vld [vmem:[%s2279_s0] ss:$2 sm:$0xff] }
   0xb   :  { %1509 = vmatpush3.bf16.msra.mxu0 %v1719_v8  ;;  %v36_v25 = vpack.c.bf16 %v1397_v22, %v1394_v21  ;;  %v1735_v29 = vld [vmem:[%s2278_s1 + $0xb8] sm:$0xff]   ;;  %v1395_v30 = vld [vmem:[%s2279_s0 + $0x2] ss:$2 sm:$0xff]  ;;  %v35_v34 = vpack.c.bf16 %v1396_v28, %v24_v27  ;;  %v1399_v60 = vld [vmem:[%s2281_s5] ss:$0 sm:$0xff] }
   0xc   :  { %1633 = vmatpush3.bf16.msra.mxu1 %v1720_v9  ;;  %1510 = vmatprep.subr.bf16.mxu0 %v1721_v10  ;;  %v1398_v31 = vld [vmem:[%s2279_s0 + $0x13] ss:$2 sm:$0xff]  ;;  %v1739_v36 = vld [vmem:[%s2280_s2 + $0x48] sm:$0xff]  }
   0xd   :  { %1634 = vmatprep.subr.bf16.mxu1 %v1814_v1  ;;  %267 = vmatprep.mubr.bf16.mxu0 %v36_v25  ;;  %v1736_v32 = vld [vmem:[%s2280_s2 + $0x40] sm:$0xff]   ;;  %v37_v37 = vpack.c.bf16 %v1398_v31, %v1395_v30  ;;  %v1740_v38 = vld [vmem:[%s2280_s2 + $0x88] sm:$0xff]   ;;  %v1742_v40 = vld [vmem:[%s2280_s2 + $0x50] sm:$0xff]  }
   0xe   :  { %v1738_v33 = vld [vmem:[%s2280_s2] sm:$0xff]   ;;  %v1741_v39 = vld [vmem:[%s2280_s2 + $0x8] sm:$0xff]   ;;  %v1743_v41 = vld [vmem:[%s2280_s2 + $0x90] sm:$0xff]  }
   0xf   :  { %1511 = vmatpush3.bf16.msra.mxu0 %v1722_v11  ;;  %v1737_v35 = vld [vmem:[%s2280_s2 + $0x80] sm:$0xff]   ;;  %v1744_v42 = vld [vmem:[%s2280_s2 + $0x10] sm:$0xff]   ;;  %v1745_v43 = vld [vmem:[%s2280_s2 + $0x58] sm:$0xff]  }
  0x10   :  { %1635 = vmatpush3.bf16.msra.mxu1 %v1723_v12  ;;  %1512 = vmatprep.subr.bf16.mxu0 %v1724_v13  ;;  %v1746_v44 = vld [vmem:[%s2280_s2 + $0x98] sm:$0xff]   ;;  %v1748_v46 = vld [vmem:[%s2280_s2 + $0x60] sm:$0xff]   ;;  %v1751_v49 = vld [vmem:[%s2280_s2 + $0x68] sm:$0xff]  }
  0x11   :  { %1636 = vmatprep.subr.bf16.mxu1 %v1814_v1  ;;  %v1747_v45 = vld [vmem:[%s2280_s2 + $0x18] sm:$0xff]   ;;  %v1749_v47 = vld [vmem:[%s2280_s2 + $0xa0] sm:$0xff]   ;;  %v1752_v50 = vld [vmem:[%s2280_s2 + $0xa8] sm:$0xff]  }
  0x12   :  { %v1750_v48 = vld [vmem:[%s2280_s2 + $0x20] sm:$0xff]   ;;  %v1753_v51 = vld [vmem:[%s2280_s2 + $0x28] sm:$0xff]   ;;  %v1754_v52 = vld [vmem:[%s2280_s2 + $0x70] sm:$0xff]  }
  0x13   :  { %1513 = vmatpush3.bf16.msra.mxu0 %v1725_v14  ;;  %v1755_v53 = vld [vmem:[%s2280_s2 + $0xb0] sm:$0xff]   ;;  %v1757_v55 = vld [vmem:[%s2280_s2 + $0x78] sm:$0xff]  }
  0x14   :  { %1637 = vmatpush3.bf16.msra.mxu1 %v1726_v15  ;;  %1514 = vmatprep.subr.bf16.mxu0 %v1727_v16  ;;  %v1756_v54 = vld [vmem:[%s2280_s2 + $0x30] sm:$0xff]   ;;  %v1758_v56 = vld [vmem:[%s2280_s2 + $0xb8] sm:$0xff]  }
  0x15   :  { %1638 = vmatprep.subr.bf16.mxu1 %v1814_v1  ;;  %v1759_v57 = vld [vmem:[%s2280_s2 + $0x38] sm:$0xff]  }
  0x17   :  { %1515 = vmatpush3.bf16.msra.mxu0 %v1728_v17 }
  0x18   :  { %1639 = vmatpush3.bf16.msra.mxu1 %v1729_v18  ;;  %1516 = vmatprep.subr.bf16.mxu0 %v1730_v19 }
  0x19   :  { %1640 = vmatprep.subr.bf16.mxu1 %v1814_v1 }
  0x1b   :  { %1517 = vmatpush3.bf16.msra.mxu0 %v1731_v20 }
  0x1c   :  { %1641 = vmatpush3.bf16.msra.mxu1 %v1732_v23  ;;  %1518 = vmatprep.subr.bf16.mxu0 %v1733_v24 }
  0x1d   :  { %1642 = vmatprep.subr.bf16.mxu1 %v1814_v1 }
  0x1f   :  { %1519 = vmatpush3.bf16.msra.mxu0 %v1734_v26 }
  0x20   :  { %1643 = vmatpush3.bf16.msra.mxu1 %v1735_v29  ;;  %1535 = vmatprep.subr.bf16.mxu0 %v1736_v32  ;;  %v1424_v32 = vld [vmem:[%s2281_s5 + $0x1] ss:$0 sm:$0xff] }
  0x21   :  { %1648 = vmatprep.subr.bf16.mxu1 %v1814_v1 }
  0x22   :  { %268 = vmatmul.mubr.bf16.vlgmr.msra.gmra.mrb[0].mxu0 %v35_v34 }
  0x23   :  { %1645 = vmatmul.mubr.bf16.vlgmr.msra.gmra.mrb[0].mxu1 %v37_v37  ;;  %1536 = vmatpush3.bf16.msra.mxu0 %v1738_v33 }
  0x24   :  { %1649 = vmatpush3.bf16.msra.mxu1 %v1737_v35  ;;  %1537 = vmatprep.subr.bf16.mxu0 %v1739_v36 }
  0x25   :  { %1650 = vmatprep.subr.bf16.mxu1 %v1814_v1  ;;  %1664 = vmatprep.mubr.msk.bf16.mxu1 %vm1815_vm0, %v1814_v1 }
  0x27   :  { %1538 = vmatpush3.bf16.msra.mxu0 %v1741_v39 }
  0x28   :  { %1651 = vmatpush3.bf16.msra.mxu1 %v1740_v38  ;;  %1539 = vmatprep.subr.bf16.mxu0 %v1742_v40 }
  0x29   :  { %1652 = vmatprep.subr.bf16.mxu1 %v1814_v1 }
  0x2b   :  { %1540 = vmatpush3.bf16.msra.mxu0 %v1744_v42 }
  0x2c   :  { %1653 = vmatpush3.bf16.msra.mxu1 %v1743_v41  ;;  %1541 = vmatprep.subr.bf16.mxu0 %v1745_v43 }
  0x2d   :  { %1654 = vmatprep.subr.bf16.mxu1 %v1814_v1 }
  0x2f   :  { %1542 = vmatpush3.bf16.msra.mxu0 %v1747_v45 }
  0x30   :  { %1655 = vmatpush3.bf16.msra.mxu1 %v1746_v44  ;;  %1543 = vmatprep.subr.bf16.mxu0 %v1748_v46 }
  0x31   :  { %1656 = vmatprep.subr.bf16.mxu1 %v1814_v1 }
  0x33   :  { %1544 = vmatpush3.bf16.msra.mxu0 %v1750_v48 }
  0x34   :  { %1657 = vmatpush3.bf16.msra.mxu1 %v1749_v47  ;;  %1545 = vmatprep.subr.bf16.mxu0 %v1751_v49 }
  0x35   :  { %1658 = vmatprep.subr.bf16.mxu1 %v1814_v1 }
  0x37   :  { %1546 = vmatpush3.bf16.msra.mxu0 %v1753_v51  ;;  %v647_v51 = vlaneseq }
  0x38   :  { %1659 = vmatpush3.bf16.msra.mxu1 %v1752_v50  ;;  %1547 = vmatprep.subr.bf16.mxu0 %v1754_v52 }
  0x39   :  { %1660 = vmatprep.subr.bf16.mxu1 %v1814_v1  ;;  %v648_v52 = vshrl.u32 %v647_v51, 7 }
  0x3b   :  { %1548 = vmatpush3.bf16.msra.mxu0 %v1756_v54  ;;  %v2055_v54 = vsub.s32 0, %v648_v52 }
  0x3c   :  { %1661 = vmatpush3.bf16.msra.mxu1 %v1755_v53  ;;  %1549 = vmatprep.subr.bf16.mxu0 %v1757_v55 }
  0x3d   :  { %1662 = vmatprep.subr.bf16.mxu1 %v1814_v1 }
  0x3f   :  { %1550 = vmatpush3.bf16.msra.mxu0 %v1759_v57 }
  0x40   :  { %1663 = vmatpush3.bf16.msra.mxu1 %v1758_v56 }
  0x41   :  { %1668 = vmatprep.subr.bf16.mxu1 %v1814_v1 }
  0xf5   :  { %v1520_v58 = vpop.f32.mrb[0].mxu0 }
  0xf6   :  { %v1521_v59 = vpop.f32.mrb[1].mxu0  ;;  %v310_v61 = vpop.f32.mrb[0].mxu1 }
  0xf7   :  { %v1522_v62 = vadd.f32 %v1521_v59, %v1520_v58  ;;  %v1523_v63 = vpop.f32.mrb[2].mxu0  ;;  %v1646_v0 = vpop.f32.mrb[1].mxu1 }
  0xf8   :  { %v1524_v2 = vpop.f32.mrb[3].mxu0  ;;  %v313_v3 = vpop.f32.mrb[2].mxu1 }
  0xf9   :  { %v270_v4 = vadd.f32 %v1522_v62, %v1399_v60  ;;  %v1525_v5 = vadd.f32 %v1524_v2, %v1523_v63  ;;  %v1647_v6 = vpop.f32.mrb[3].mxu1 }
  0xfb   :  { %v311_v7 = vadd.f32 %v310_v61, %v270_v4  ;;  %v273_v8 = vadd.f32 %v1525_v5, %v1399_v60  ;;  %v1761_v4 = vld [vmem:[%s2282_s3 + $0x80] sm:$0xff]  }
  0xfc   :  { %v1762_v5 = vld [vmem:[%s2282_s3] sm:$0xff]  }
  0xfd   :  { %vm317_vm1 = vcmp.ge.f32.partialorder %v311_v7, 0.0  ;;  %v319_v9 = vmul.f32 0.2, %v311_v7  ;;  %v314_v10 = vadd.f32 %v313_v3, %v273_v8  ;;  %v1760_v3 = vld [vmem:[%s2282_s3 + $0x40] sm:$0xff]   ;;  %v1764_v8 = vld [vmem:[%s2282_s3 + $0x88] sm:$0xff]  }
  0xfe   :  { %1566 = vmatprep.subr.bf16.mxu0 %v1760_v3 }
  0xff   :  { %v321_v11 = vsel %vm317_vm1, %v311_v7, %v319_v9  ;;  %vm318_vm2 = vcmp.ge.f32.partialorder %v314_v10, 0.0  ;;  %v320_v12 = vmul.f32 0.2, %v314_v10  ;;  %v1763_v7 = vld [vmem:[%s2282_s3 + $0x48] sm:$0xff]  }
 0x100   :  { %324 = vst [vmem:[#allocation2 + $0x1] sm:$0xff] %v321_v11  ;;  %v1766_v11 = vld [vmem:[%s2282_s3 + $0x50] sm:$0xff]  }
 0x101   :  { %v322_v13 = vsel %vm318_vm2, %v314_v10, %v320_v12  ;;  %v1765_v10 = vld [vmem:[%s2282_s3 + $0x8] sm:$0xff]   ;;  %v1767_v12 = vld [vmem:[%s2282_s3 + $0x90] sm:$0xff]  }
 0x102   :  { %326 = vst [vmem:[#allocation2 + $0xa] sm:$0xff] %v322_v13  ;;  %v1768_v13 = vld [vmem:[%s2282_s3 + $0x10] sm:$0xff]  }
 0x107   :  { %v329_v14 = vld [vmem:[#allocation2 + $0x1] ss:$2 sm:$0xf]  ;;  %v331_v20 = vld [vmem:[#allocation2 + $0x2] ss:$2 sm:$0xf] }
 0x108   :  { %v327_v24 = vld [vmem:[#allocation2] ss:$2 sm:$0xf] }
 0x109   :  { %v335_v15 = vld [vmem:[#allocation2 + $0xa] ss:$2 sm:$0xf]  ;;  %v337_v16 = vld [vmem:[#allocation2 + $0xb] ss:$2 sm:$0xf] }
 0x10a   :  { %v342_v17 = vrot.slane %v335_v15, 4  ;;  %v343_v18 = vrot.slane %v337_v16, 4  ;;  %v333_v19 = vld [vmem:[#allocation2 + $0x9] ss:$2 sm:$0xf]  ;;  %v1770_v15 = vld [vmem:[%s2282_s3 + $0x98] sm:$0xff]  }
 0x10b   :  { %v341_v21 = vrot.slane %v333_v19, 4  ;;  %v1771_v16 = vld [vmem:[%s2282_s3 + $0x18] sm:$0xff]   ;;  %v1774_v19 = vld [vmem:[%s2282_s3 + $0x20] sm:$0xff]  }
 0x10c   :  { %v349_v22 = vsel %vm347_vm3, %v329_v14, %v342_v17  ;;  %v350_v23 = vsel %vm347_vm3, %v331_v20, %v343_v18  ;;  %v1769_v14 = vld [vmem:[%s2282_s3 + $0x58] sm:$0xff]   ;;  %v1772_v17 = vld [vmem:[%s2282_s3 + $0x60] sm:$0xff]   ;;  %v1775_v20 = vld [vmem:[%s2282_s3 + $0x68] sm:$0xff]  }
 0x10d   :  { %v352_v25 = vpack.c.bf16 %v349_v22, %v349_v22  ;;  %v353_v26 = vpack.c.bf16 %v350_v23, %v350_v23  ;;  %v348_v27 = vsel %vm347_vm3, %v327_v24, %v341_v21  ;;  %v1773_v18 = vld [vmem:[%s2282_s3 + $0xa0] sm:$0xff]   ;;  %v1776_v21 = vld [vmem:[%s2282_s3 + $0xa8] sm:$0xff]   ;;  %v1778_v23 = vld [vmem:[%s2282_s3 + $0x70] sm:$0xff]  }
 0x10e   :  { %v351_v28 = vpack.c.bf16 %v348_v27, %v348_v27  ;;  %v1777_v22 = vld [vmem:[%s2282_s3 + $0x28] sm:$0xff]   ;;  %v1779_v24 = vld [vmem:[%s2282_s3 + $0xb0] sm:$0xff]   ;;  %v1782_v27 = vld [vmem:[%s2282_s3 + $0xb8] sm:$0xff]  }
 0x10f   :  { %583 = vmatprep.mubr.bf16.mxu0 %v352_v25  ;;  %1665 = vmatmul.mubr.bf16.vlgmr.msra.gmra.mrb[4].mxu1 %v353_v26  ;;  %v1780_v25 = vld [vmem:[%s2282_s3 + $0x30] sm:$0xff]   ;;  %v1781_v26 = vld [vmem:[%s2282_s3 + $0x78] sm:$0xff]  }
 0x110   :  { %584 = vmatmul.mubr.bf16.vlgmr.msra.gmra.mrb[4].mxu0 %v351_v28  ;;  %1684 = vmatprep.mubr.msk.bf16.mxu1 %vm1815_vm0, %v1814_v1  ;;  %v1783_v28 = vld [vmem:[%s2282_s3 + $0x38] sm:$0xff]  }
 0x111   :  { %1669 = vmatpush3.bf16.msra.mxu1 %v1761_v4  ;;  %1567 = vmatpush3.bf16.msra.mxu0 %v1762_v5 }
 0x112   :  { %1670 = vmatprep.subr.bf16.mxu1 %v1814_v1  ;;  %1568 = vmatprep.subr.bf16.mxu0 %v1763_v7 }
 0x115   :  { %1671 = vmatpush3.bf16.msra.mxu1 %v1764_v8  ;;  %1569 = vmatpush3.bf16.msra.mxu0 %v1765_v10 }
 0x116   :  { %1672 = vmatprep.subr.bf16.mxu1 %v1814_v1  ;;  %1570 = vmatprep.subr.bf16.mxu0 %v1766_v11 }
 0x119   :  { %1673 = vmatpush3.bf16.msra.mxu1 %v1767_v12  ;;  %1571 = vmatpush3.bf16.msra.mxu0 %v1768_v13 }
 0x11a   :  { %1674 = vmatprep.subr.bf16.mxu1 %v1814_v1  ;;  %1572 = vmatprep.subr.bf16.mxu0 %v1769_v14 }
 0x11d   :  { %1675 = vmatpush3.bf16.msra.mxu1 %v1770_v15  ;;  %1573 = vmatpush3.bf16.msra.mxu0 %v1771_v16 }
 0x11e   :  { %1676 = vmatprep.subr.bf16.mxu1 %v1814_v1  ;;  %1574 = vmatprep.subr.bf16.mxu0 %v1772_v17 }
 0x121   :  { %1677 = vmatpush3.bf16.msra.mxu1 %v1773_v18  ;;  %1575 = vmatpush3.bf16.msra.mxu0 %v1774_v19 }
 0x122   :  { %1678 = vmatprep.subr.bf16.mxu1 %v1814_v1  ;;  %1576 = vmatprep.subr.bf16.mxu0 %v1775_v20 }
 0x125   :  { %1679 = vmatpush3.bf16.msra.mxu1 %v1776_v21  ;;  %1577 = vmatpush3.bf16.msra.mxu0 %v1777_v22 }
 0x126   :  { %1680 = vmatprep.subr.bf16.mxu1 %v1814_v1  ;;  %1578 = vmatprep.subr.bf16.mxu0 %v1778_v23 }
 0x129   :  { %1681 = vmatpush3.bf16.msra.mxu1 %v1779_v24  ;;  %1579 = vmatpush3.bf16.msra.mxu0 %v1780_v25  ;;  %v1784_v24 = vld [vmem:[%s2283_s4 + $0x40] sm:$0xff]  }
 0x12a   :  { %1682 = vmatprep.subr.bf16.mxu1 %v1814_v1  ;;  %1580 = vmatprep.subr.bf16.mxu0 %v1781_v26  ;;  %v1785_v26 = vld [vmem:[%s2283_s4 + $0x80] sm:$0xff]  }
 0x12d   :  { %1683 = vmatpush3.bf16.msra.mxu1 %v1782_v27  ;;  %1581 = vmatpush3.bf16.msra.mxu0 %v1783_v28  ;;  %v1786_v27 = vld [vmem:[%s2283_s4] sm:$0xff]  }
 0x12e   :  { %1688 = vmatprep.subr.bf16.mxu1 %v1814_v1  ;;  %1597 = vmatprep.subr.bf16.mxu0 %v1784_v24 }
 0x1e2   :  { %v625_v29 = vpop.f32.mrb[4].mxu1 }
 0x1e3   :  { %v1551_v30 = vpop.f32.mrb[4].mxu0  ;;  %v1666_v31 = vpop.f32.mrb[5].mxu1 }
 0x1e4   :  { %v1552_v33 = vpop.f32.mrb[5].mxu0  ;;  %v628_v34 = vpop.f32.mrb[6].mxu1 }
 0x1e5   :  { %v1553_v35 = vadd.f32 %v1552_v33, %v1551_v30  ;;  %v1554_v36 = vpop.f32.mrb[6].mxu0  ;;  %v1667_v37 = vpop.f32.mrb[7].mxu1  ;;  %v666_v33 = vld [vmem:[%s2281_s5 + $0x2] sm:$0x1] }
 0x1e6   :  { %v1555_v38 = vpop.f32.mrb[7].mxu0  ;;  %v1449_v37 = vld [vmem:[%s2281_s5 + $0x3] ss:$0 sm:$0xff] }
 0x1e7   :  { %v586_v39 = vadd.f32 %v1553_v35, %v1424_v32 }
 0x1e9   :  { %v626_v40 = vadd.f32 %v625_v29, %v586_v39 }
 0x1eb   :  { %vm631_vm4 = vcmp.ge.f32.partialorder %v626_v40, 0.0  ;;  %v632_v41 = vmul.f32 0.2, %v626_v40 }
 0x1ed   :  { %v633_v42 = vsel %vm631_vm4, %v626_v40, %v632_v41 }
 0x1ee   :  { %v634_v43 = vrot.slane %v633_v42, 4 }
 0x1f0   :  { %v635_v44 = vadd.f32 %v634_v43, %v633_v42 }
 0x1f2   :  { %v636_v45 = vrot.slane %v635_v44, 2 }
 0x1f4   :  { %v637_v46 = vadd.f32 %v636_v45, %v635_v44 }
 0x1f6   :  { %v638_v47 = vrot.slane %v637_v46, 1 }
 0x1f8   :  { %v639_v48 = vadd.f32 %v638_v47, %v637_v46 }
 0x1fa   :  { %640 = vrot.lane.b32.xlu0 %v639_v48, %s1816_s8 }
 0x26c   :  { %v641_v49 = vpop.permute.xlu0 %640 }
 0x26d   :  { %v642_v50 = vadd.f32 %v641_v49, %v639_v48 }
 0x26f   :  { %643 = vrot.lane.b32.xlu0 %v642_v50, %s1817_s9 }
 0x2e1   :  { %v644_v53 = vpop.permute.xlu0 %643 }
 0x2e2   :  { %v645_v55 = vadd.f32 %v644_v53, %v642_v50 }
 0x2e4   :  { %v646_v56 = vmul.f32 0.03125, %v645_v55 }
 0x2e6   :  { %v650_v57 = vrot.slane %v646_v56, %v2055_v54 }
 0x2e8   :  { %v2058_v58 = vsub.f32 %v633_v42, %v650_v57 }
 0x2ea   :  { %v652_v59 = vmul.f32 %v2058_v58, %v2058_v58 }
 0x2ec   :  { %v653_v60 = vrot.slane %v652_v59, 4 }
 0x2ee   :  { %v654_v61 = vadd.f32 %v653_v60, %v652_v59  ;;  %v1450_v59 = vld [vmem:[%s2281_s5 + $0x4] ss:$0 sm:$0xff] }
 0x2f0   :  { %v655_v62 = vrot.slane %v654_v61, 2 }
 0x2f2   :  { %v656_v63 = vadd.f32 %v655_v62, %v654_v61 }
 0x2f4   :  { %v657_v0 = vrot.slane %v656_v63, 1 }
 0x2f6   :  { %v658_v2 = vadd.f32 %v657_v0, %v656_v63 }
 0x2f8   :  { %659 = vrot.lane.b32.xlu1 %v658_v2, %s1816_s8 }
 0x36a   :  { %v660_v6 = vpop.permute.xlu1 %659 }
 0x36b   :  { %v661_v9 = vadd.f32 %v660_v6, %v658_v2 }
 0x36d   :  { %662 = vrot.lane.b32.xlu1 %v661_v9, %s1817_s9 }
 0x3df   :  { %v663_v29 = vpop.permute.xlu1 %662 }
 0x3e0   :  { %v664_v30 = vadd.f32 %v663_v29, %v661_v9  ;;  %v1787_v29 = vld [vmem:[%s2283_s4 + $0x48] sm:$0xff]  }
 0x3e2   :  { %v665_v31 = vmul.f32 0.03125, %v664_v30 }
 0x3e4   :  { %v667_v32 = vadd.f32 0.8, %v665_v31  ;;  %v1788_v31 = vld [vmem:[%s2283_s4 + $0x88] sm:$0xff]  }
 0x3e6   :  { %1808 = vrsqrt.f32 %v667_v32  ;;  %v1789_v32 = vld [vmem:[%s2283_s4 + $0x8] sm:$0xff]  }
 0x3f0   :  { %v1809_v34 = vpop.eup %1808 }
 0x3f1   :  { %v669_v35 = vmul.f32 %v1809_v34, %v666_v33  ;;  %v1790_v33 = vld [vmem:[%s2283_s4 + $0x50] sm:$0xff]  }
 0x3f2   :  { %v1791_v34 = vld [vmem:[%s2283_s4 + $0x90] sm:$0xff]  }
 0x3f3   :  { %v673_v36 = vrot.slane %v669_v35, %v2055_v54  ;;  %v1792_v35 = vld [vmem:[%s2283_s4 + $0x10] sm:$0xff]  }
 0x3f5   :  { %v674_v38 = vmul.f32 %v673_v36, %v2058_v58  ;;  %v1793_v36 = vld [vmem:[%s2283_s4 + $0x58] sm:$0xff]  }
 0x3f7   :  { %v680_v39 = vadd.f32 %v1449_v37, %v674_v38  ;;  %v1794_v37 = vld [vmem:[%s2283_s4 + $0x98] sm:$0xff]  }
 0x3f8   :  { %v1795_v38 = vld [vmem:[%s2283_s4 + $0x18] sm:$0xff]  }
 0x3f9   :  { %682 = vst [vmem:[#allocation3 + $0x1] ss:$5 sps:$4 sm:$0xff] %v680_v39   ;;  %v1796_v39 = vld [vmem:[%s2283_s4 + $0x60] sm:$0xff]  }
 0x400   :  { %v693_v40 = vld [vmem:[#allocation3 + $0x6] ss:$2 sm:$0x3]  ;;  %v687_v42 = vld [vmem:[#allocation3 + $0x1] ss:$2 sm:$0x3] }
 0x401   :  { %v700_v41 = vrot.slane %v693_v40, 6  ;;  %v695_v43 = vld [vmem:[#allocation3 + $0x7] ss:$2 sm:$0x3] }
 0x402   :  { %v701_v45 = vrot.slane %v695_v43, 6  ;;  %v691_v46 = vld [vmem:[#allocation3 + $0x5] ss:$2 sm:$0x3]  ;;  %v1797_v40 = vld [vmem:[%s2283_s4 + $0xa0] sm:$0xff]   ;;  %v1800_v43 = vld [vmem:[%s2283_s4 + $0xa8] sm:$0xff]  }
 0x403   :  { %v707_v44 = vsel %vm705_vm5, %v687_v42, %v700_v41  ;;  %v689_v48 = vld [vmem:[#allocation3 + $0x2] ss:$2 sm:$0x3]  ;;  %v699_v49 = vrot.slane %v691_v46, 6  ;;  %v1798_v41 = vld [vmem:[%s2283_s4 + $0x20] sm:$0xff]   ;;  %v1799_v42 = vld [vmem:[%s2283_s4 + $0x68] sm:$0xff]  }
 0x404   :  { %v710_v47 = vpack.c.bf16 %v707_v44, %v707_v44  ;;  %v708_v50 = vsel %vm705_vm5, %v689_v48, %v701_v45  ;;  %v685_v51 = vld [vmem:[#allocation3] ss:$2 sm:$0x3]  ;;  %v1801_v44 = vld [vmem:[%s2283_s4 + $0x28] sm:$0xff]   ;;  %v1802_v45 = vld [vmem:[%s2283_s4 + $0x70] sm:$0xff]  }
 0x405   :  { %v711_v52 = vpack.c.bf16 %v708_v50, %v708_v50  ;;  %v706_v53 = vsel %vm705_vm5, %v685_v51, %v699_v49  ;;  %v1803_v46 = vld [vmem:[%s2283_s4 + $0xb0] sm:$0xff]   ;;  %v1805_v48 = vld [vmem:[%s2283_s4 + $0x78] sm:$0xff]  }
 0x406   :  { %941 = vmatprep.mubr.bf16.mxu0 %v710_v47  ;;  %v709_v55 = vpack.c.bf16 %v706_v53, %v706_v53  ;;  %v1804_v47 = vld [vmem:[%s2283_s4 + $0x30] sm:$0xff]   ;;  %v1806_v49 = vld [vmem:[%s2283_s4 + $0xb8] sm:$0xff]  }
 0x407   :  { %1685 = vmatmul.mubr.bf16.vlgmr.msra.gmra.mrb[8].mxu1 %v711_v52  ;;  %v1807_v50 = vld [vmem:[%s2283_s4 + $0x38] sm:$0xff]  }
 0x408   :  { %942 = vmatmul.mubr.bf16.vlgmr.msra.gmra.mrb[8].mxu0 %v709_v55  ;;  %1704 = vmatprep.mubr.msk.bf16.mxu1 %vm1815_vm0, %v1814_v1 }
 0x409   :  { %1689 = vmatpush3.bf16.msra.mxu1 %v1785_v26  ;;  %1598 = vmatpush3.bf16.msra.mxu0 %v1786_v27 }
 0x40a   :  { %1690 = vmatprep.subr.bf16.mxu1 %v1814_v1  ;;  %1599 = vmatprep.subr.bf16.mxu0 %v1787_v29 }
 0x40d   :  { %1691 = vmatpush3.bf16.msra.mxu1 %v1788_v31  ;;  %1600 = vmatpush3.bf16.msra.mxu0 %v1789_v32 }
 0x40e   :  { %1692 = vmatprep.subr.bf16.mxu1 %v1814_v1  ;;  %1601 = vmatprep.subr.bf16.mxu0 %v1790_v33 }
 0x411   :  { %1693 = vmatpush3.bf16.msra.mxu1 %v1791_v34  ;;  %1602 = vmatpush3.bf16.msra.mxu0 %v1792_v35 }
 0x412   :  { %1694 = vmatprep.subr.bf16.mxu1 %v1814_v1  ;;  %1603 = vmatprep.subr.bf16.mxu0 %v1793_v36 }
 0x415   :  { %1695 = vmatpush3.bf16.msra.mxu1 %v1794_v37  ;;  %1604 = vmatpush3.bf16.msra.mxu0 %v1795_v38 }
 0x416   :  { %1696 = vmatprep.subr.bf16.mxu1 %v1814_v1  ;;  %1605 = vmatprep.subr.bf16.mxu0 %v1796_v39 }
 0x419   :  { %1697 = vmatpush3.bf16.msra.mxu1 %v1797_v40  ;;  %1606 = vmatpush3.bf16.msra.mxu0 %v1798_v41 }
 0x41a   :  { %1698 = vmatprep.subr.bf16.mxu1 %v1814_v1  ;;  %1607 = vmatprep.subr.bf16.mxu0 %v1799_v42 }
 0x41d   :  { %1699 = vmatpush3.bf16.msra.mxu1 %v1800_v43  ;;  %1608 = vmatpush3.bf16.msra.mxu0 %v1801_v44 }
 0x41e   :  { %1700 = vmatprep.subr.bf16.mxu1 %v1814_v1  ;;  %1609 = vmatprep.subr.bf16.mxu0 %v1802_v45 }
 0x421   :  { %1701 = vmatpush3.bf16.msra.mxu1 %v1803_v46  ;;  %1610 = vmatpush3.bf16.msra.mxu0 %v1804_v47  ;;  %v1359_v47 = vld [vmem:[%s2281_s5 + $0x8] sm:$0x1] }
 0x422   :  { %1702 = vmatprep.subr.bf16.mxu1 %v1814_v1  ;;  %1611 = vmatprep.subr.bf16.mxu0 %v1805_v48 }
 0x425   :  { %1703 = vmatpush3.bf16.msra.mxu1 %v1806_v49  ;;  %1612 = vmatpush3.bf16.msra.mxu0 %v1807_v50 }
 0x4da   :  { %v983_v56 = vpop.f32.mrb[8].mxu1 }
 0x4db   :  { %v1582_v57 = vpop.f32.mrb[8].mxu0  ;;  %v1686_v58 = vpop.f32.mrb[9].mxu1 }
 0x4dc   :  { %v1583_v60 = vpop.f32.mrb[9].mxu0  ;;  %v986_v61 = vpop.f32.mrb[10].mxu1 }
 0x4dd   :  { %v1584_v62 = vadd.f32 %v1583_v60, %v1582_v57  ;;  %v1585_v63 = vpop.f32.mrb[10].mxu0  ;;  %v1687_v0 = vpop.f32.mrb[11].mxu1 }
 0x4de   :  { %v1586_v2 = vpop.f32.mrb[11].mxu0  ;;  %v1039_v0 = vld [vmem:[#allocation4] sm:$0x1] }
 0x4df   :  { %v944_v3 = vadd.f32 %v1584_v62, %v1450_v59  ;;  %v1475_v59 = vld [vmem:[%s2281_s5 + $0x6] ss:$0 sm:$0xff]  ;;  %v1042_v62 = vld [vmem:[#allocation4 + $0x3] sm:$0x1] }
 0x4e0   :  { %v1048_v63 = vrot.slane %v1042_v62, 7 }
 0x4e1   :  { %v984_v4 = vadd.f32 %v983_v56, %v944_v3  ;;  %v1020_v56 = vld [vmem:[%s2281_s5 + $0x5] sm:$0x1] }
 0x4e2   :  { %v1055_v3 = vsel %vm1054_vm7, %v1039_v0, %v1048_v63 }
 0x4e3   :  { %vm989_vm6 = vcmp.ge.f32.partialorder %v984_v4, 0.0  ;;  %v990_v5 = vmul.f32 0.2, %v984_v4 }
 0x4e5   :  { %v991_v6 = vsel %vm989_vm6, %v984_v4, %v990_v5 }
 0x4e6   :  { %v992_v7 = vsel %vm347_vm3, %v991_v6, 0.0 }
 0x4e7   :  { %v993_v8 = vrot.slane %v992_v7, 4 }
 0x4e9   :  { %v994_v9 = vadd.f32 %v993_v8, %v992_v7 }
 0x4eb   :  { %v995_v10 = vrot.slane %v994_v9, 2 }
 0x4ed   :  { %v996_v11 = vadd.f32 %v995_v10, %v994_v9  ;;  %v1058_v10 = vpack.c.bf16 %v1055_v3, %v1055_v3 }
 0x4ef   :  { %v997_v12 = vrot.slane %v996_v11, 1 }
 0x4f1   :  { %v998_v13 = vadd.f32 %v997_v12, %v996_v11 }
 0x4f3   :  { %999 = vrot.lane.b32.xlu0 %v998_v13, %s1816_s8 }
 0x565   :  { %v1000_v14 = vpop.permute.xlu0 %999 }
 0x566   :  { %v1001_v15 = vadd.f32 %v1000_v14, %v998_v13 }
 0x568   :  { %v1002_v16 = vmul.f32 0.125, %v1001_v15 }
 0x56a   :  { %v1006_v17 = vrot.slane %v1002_v16, %v2055_v54 }
 0x56c   :  { %v2163_v18 = vsub.f32 %v991_v6, %v1006_v17  ;;  %v1476_v17 = vld [vmem:[%s2281_s5 + $0x7] ss:$0 sm:$0xff] }
 0x56e   :  { %v1008_v19 = vmul.f32 %v2163_v18, %v2163_v18 }
 0x570   :  { %v1009_v20 = vsel %vm347_vm3, %v1008_v19, 0.0 }
 0x571   :  { %v1010_v21 = vrot.slane %v1009_v20, 4 }
 0x573   :  { %v1011_v22 = vadd.f32 %v1010_v21, %v1009_v20 }
 0x575   :  { %v1012_v23 = vrot.slane %v1011_v22, 2 }
 0x577   :  { %v1013_v25 = vadd.f32 %v1012_v23, %v1011_v22 }
 0x579   :  { %v1014_v28 = vrot.slane %v1013_v25, 1 }
 0x57b   :  { %v1015_v30 = vadd.f32 %v1014_v28, %v1013_v25 }
 0x57d   :  { %1016 = vrot.lane.b32.xlu1 %v1015_v30, %s1816_s8 }
 0x5ef   :  { %v1017_v51 = vpop.permute.xlu1 %1016 }
 0x5f0   :  { %v1018_v52 = vadd.f32 %v1017_v51, %v1015_v30  ;;  %v1501_v51 = vld [vmem:[%s2281_s5 + $0x9] ss:$0 sm:$0xff] }
 0x5f2   :  { %v1019_v53 = vmul.f32 0.125, %v1018_v52 }
 0x5f4   :  { %v1021_v55 = vadd.f32 0.8, %v1019_v53  ;;  %v1502_v53 = vld [vmem:[%s2281_s5 + $0xa] ss:$0 sm:$0xff] }
 0x5f6   :  { %1810 = vrsqrt.f32 %v1021_v55 }
 0x600   :  { %v1811_v57 = vpop.eup %1810 }
 0x601   :  { %v1023_v58 = vmul.f32 %v1811_v57, %v1020_v56 }
 0x603   :  { %v1027_v1 = vrot.slane %v1023_v58, %v2055_v54  ;;  %v1503_v58 = vld [vmem:[%s2281_s5 + $0xb] ss:$0 sm:$0xff] }
 0x605   :  { %v1028_v60 = vmul.f32 %v1027_v1, %v2163_v18 }
 0x607   :  { %v1034_v61 = vadd.f32 %v1475_v59, %v1028_v60 }
 0x609   :  { %1036 = vst [vmem:[#allocation4 + $0x1] sm:$0x3] %v1034_v61  ;;  %1038 = vst [vmem:[#allocation4 + $0x2] sm:$0xc] %v1034_v61 }
 0x610   :  { %v1043_v2 = vld [vmem:[#allocation4 + $0x4] sm:$0x1]  ;;  %v1044_v5 = vld [vmem:[#allocation4 + $0x5] sm:$0x1]  ;;  %v1040_v6 = vld [vmem:[#allocation4 + $0x1] sm:$0x1] }
 0x611   :  { %v1049_v4 = vrot.slane %v1043_v2, 7  ;;  %v1050_v7 = vrot.slane %v1044_v5, 7  ;;  %v1041_v9 = vld [vmem:[#allocation4 + $0x2] sm:$0x1] }
 0x613   :  { %v1056_v8 = vsel %vm1054_vm7, %v1040_v6, %v1049_v4  ;;  %v1057_v12 = vsel %vm1054_vm7, %v1041_v9, %v1050_v7 }
 0x614   :  { %v1059_v11 = vpack.c.bf16 %v1056_v8, %v1056_v8  ;;  %v1060_v13 = vpack.c.bf16 %v1057_v12, %v1057_v12 }
 0x616   :  { %1290 = vmatprep.mubr.bf16.mxu0 %v1059_v11  ;;  %1705 = vmatmul.mubr.bf16.vlgmr.msra.gmra.mrb[12].mxu1 %v1060_v13 }
 0x617   :  { %1291 = vmatmul.mubr.bf16.vlgmr.msra.gmra.mrb[12].mxu0 %v1058_v10 }
 0x6e9   :  { %v1332_v14 = vpop.f32.mrb[12].mxu1 }
 0x6ea   :  { %v1613_v15 = vpop.f32.mrb[12].mxu0  ;;  %v1706_v16 = vpop.f32.mrb[13].mxu1 }
 0x6eb   :  { %v1614_v18 = vpop.f32.mrb[13].mxu0  ;;  %v1335_v20 = vpop.f32.mrb[14].mxu1 }
 0x6ec   :  { %v1615_v19 = vadd.f32 %v1614_v18, %v1613_v15  ;;  %v1616_v21 = vpop.f32.mrb[14].mxu0  ;;  %v1707_v22 = vpop.f32.mrb[15].mxu1 }
 0x6ed   :  { %v1617_v23 = vpop.f32.mrb[15].mxu0 }
 0x6ee   :  { %v1293_v24 = vadd.f32 %v1615_v19, %v1476_v17 }
 0x6f0   :  { %v1333_v25 = vadd.f32 %v1332_v14, %v1293_v24 }
 0x6f2   :  { %vm1338_vm8 = vcmp.ge.f32.partialorder %v1333_v25, 0.0  ;;  %v1339_v26 = vmul.f32 0.2, %v1333_v25 }
 0x6f4   :  { %v1340_v27 = vsel %vm1338_vm8, %v1333_v25, %v1339_v26 }
 0x6f5   :  { %v1341_v28 = vsel %vm705_vm5, %v1340_v27, 0.0 }
 0x6f6   :  { %v1342_v29 = vrot.slane %v1341_v28, 4 }
 0x6f8   :  { %v1343_v30 = vadd.f32 %v1342_v29, %v1341_v28 }
 0x6fa   :  { %v1344_v31 = vrot.slane %v1343_v30, 2 }
 0x6fc   :  { %v1345_v32 = vadd.f32 %v1344_v31, %v1343_v30 }
 0x6fe   :  { %v1346_v33 = vrot.slane %v1345_v32, 1 }
 0x700   :  { %v1347_v34 = vadd.f32 %v1346_v33, %v1345_v32 }
 0x702   :  { %v1348_v35 = vmul.f32 0.5, %v1347_v34 }
 0x704   :  { %v1349_v36 = vsub.f32 %v1340_v27, %v1348_v35 }
 0x706   :  { %v1350_v37 = vmul.f32 %v1349_v36, %v1349_v36 }
 0x708   :  { %v1351_v38 = vsel %vm705_vm5, %v1350_v37, 0.0 }
 0x709   :  { %v1352_v39 = vrot.slane %v1351_v38, 4 }
 0x70b   :  { %v1353_v40 = vadd.f32 %v1352_v39, %v1351_v38 }
 0x70d   :  { %v1354_v41 = vrot.slane %v1353_v40, 2 }
 0x70f   :  { %v1355_v42 = vadd.f32 %v1354_v41, %v1353_v40 }
 0x711   :  { %v1356_v43 = vrot.slane %v1355_v42, 1 }
 0x713   :  { %v1357_v44 = vadd.f32 %v1356_v43, %v1355_v42 }
 0x715   :  { %v1358_v45 = vmul.f32 0.5, %v1357_v44 }
 0x717   :  { %v1360_v46 = vadd.f32 0.8, %v1358_v45 }
 0x719   :  { %1812 = vrsqrt.f32 %v1360_v46 }
 0x723   :  { %v1813_v48 = vpop.eup %1812 }
 0x724   :  { %v1362_v49 = vmul.f32 %v1813_v48, %v1359_v47 }
 0x726   :  { %v1366_v50 = vrot.slane %v1362_v49, %v2055_v54 }
 0x728   :  { %v1367_v52 = vmul.f32 %v1366_v50, %v1349_v36 }
 0x72a   :  { %v1373_v55 = vadd.f32 %v1501_v51, %v1367_v52 }
 0x72c   :  { %v1380_v56 = vmul.f32 %v1502_v53, %v1373_v55 }
 0x72e   :  { %v1381_v57 = vsel %vm705_vm5, %v1380_v56, 0.0 }
 0x72f   :  { %1382 = vadd.xlane.f32.xlu0 %v1381_v57 }
 0x7bc   :  { %v1383_v1 = vpop.xlane.xlu0 %1382 }
 0x7bd   :  { %v1388_v54 = vadd.f32 %v1503_v58, %v1383_v1 }
 0x7bf   :  { %1389 = vst [vmem:[%s2284_s6] sm:$0x3] %v1388_v54 }

</bundles_post_ra>
